<compile_context>
chip_gen: v6e
topology: v6e:2x2x1
jax: 0.10.0
libtpu: 0.0.40
codegen_flags: <defaults>
</compile_context>

<pallas_src>
import jax
import jax.numpy as jnp
from jax import lax
from jax.experimental import pallas as pl
from jax.experimental.pallas import tpu as pltpu


# ----------------------------------------------------------------------------
# Tiling helpers
# ----------------------------------------------------------------------------
def _round_up(v, m):
    return (v + m - 1) // m * m


def _target_w_tile_bytes():
    """Per-generation W-tile target (HBM-roofline amortization vs VMEM cap)."""
    try:
        kind = jax.devices()[0].device_kind.lower()
    except Exception:  # pragma: no cover - defensive
        kind = ""
    if "v7" in kind:
        return 6 << 20   # v7x: 3.2 TB/s HBM -> bigger tiles hide per-step overhead
    if "v5" in kind:
        return 3 << 20   # v5e: slower HBM + tighter scoped-VMEM budget
    return 4 << 20       # v6e default


def _choose_tk(k_dim, n_out, elem_bytes, target_bytes):
    """Largest divisor of K that is a multiple of 128 with W tile <= target."""
    assert k_dim % 128 == 0
    if k_dim * n_out * elem_bytes <= target_bytes:
        return k_dim
    units = k_dim // 128
    max_units = max(1, min(units, target_bytes // (128 * n_out * elem_bytes)))
    best = 1
    for d in range(1, int(max_units) + 1):
        if units % d == 0:
            best = d
    return best * 128


# ----------------------------------------------------------------------------
# K-tiled Linear kernel:  partial[s] = x[:, Ks] @ W[:, Ks].T   (f32 accumulate)
#   grid = (num_splits [parallel], k_tiles_per_split [arbitrary])
#   The output block is resident across the reduction axis and doubles as the
#   f32 accumulator (no scratch).  Bias/ReLU/split-sum epilogue is done in JAX
#   (tiny (N, 128) op).
# ----------------------------------------------------------------------------
def _linear_accum_kernel(x_ref, w_ref, o_ref):
    @pl.when(pl.program_id(1) == 0)
    def _():
        o_ref[...] = jnp.zeros_like(o_ref)

    # (N, TK) x (Nout, TK) -> (N, Nout); contract the LAST dim of both
    # operands so no weight transpose is ever materialized.
    o_ref[...] += lax.dot_general(
        x_ref[...], w_ref[...],
        dimension_numbers=(((1,), (1,)), ((), ())),
        preferred_element_type=jnp.float32)


def pallas_linear_bf16(x, w_bf16, b, *, apply_relu):
    """y = (ReLU)(x @ w.T + b); bf16 streaming, f32 accumulation, K-tiled."""
    n, k_dim = x.shape
    n_out, k_w = w_bf16.shape
    assert b.shape == (n_out,)

    # Weights were padded to a multiple of 128 once at prepare time; pad the
    # activations to match (no-op for the real model's K values).
    if k_w != k_dim:
        x = jnp.pad(x, ((0, 0), (0, k_w - k_dim)))
        k_dim = k_w

    x_bf16 = x.astype(jnp.bfloat16)

    tk = _choose_tk(k_dim, n_out, 2, _target_w_tile_bytes())
    k_tiles = k_dim // tk
    # Split the reduction across a leading "parallel" axis so v7x can use both
    # TensorCores; on single-TC chips the extra partial output is negligible.
    num_splits = 2 if (k_tiles >= 2 and k_tiles % 2 == 0) else 1
    kps = k_tiles // num_splits

    # VMEM budget: double-buffered W and x tiles + double-buffered output.
    vmem_bytes = (2 * n_out * tk * 2) + (2 * n * tk * 2) + (2 * n * n_out * 4)
    vmem_limit = int(max(vmem_bytes + (4 << 20), 32 << 20))

    partials = pl.pallas_call(
        _linear_accum_kernel,
        out_shape=jax.ShapeDtypeStruct((num_splits, n, n_out), jnp.float32),
        grid_spec=pltpu.PrefetchScalarGridSpec(
            num_scalar_prefetch=0,
            grid=(num_splits, kps),
            in_specs=[
                pl.BlockSpec((n, tk),
                             lambda s, kk, kps=kps: (0, s * kps + kk)),
                pl.BlockSpec((n_out, tk),
                             lambda s, kk, kps=kps: (0, s * kps + kk)),
            ],
            out_specs=pl.BlockSpec((None, n, n_out), lambda s, kk: (s, 0, 0)),
        ),
        compiler_params=pltpu.CompilerParams(
            dimension_semantics=("parallel", "arbitrary"),
            vmem_limit_bytes=vmem_limit),
    )(x_bf16, w_bf16)

    y = jnp.sum(partials, axis=0) + b[None, :]
    if apply_relu:
        y = jnp.maximum(y, 0.0)
    return y


# ----------------------------------------------------------------------------
# One-time parameter preparation (call OUTSIDE the jitted step function):
# stage weights -> bf16 (halves HBM streaming), K padded to a multiple of 128.
# ----------------------------------------------------------------------------
def prepare_params(params):
    prepped = {}
    for stage in ("v1", "v2", "v4", "it"):
        w = jnp.asarray(params[f"w_{stage}"])
        k = w.shape[1]
        kp = _round_up(k, 128)
        if kp != k:
            w = jnp.pad(w, ((0, 0), (0, kp - k)))
        prepped[f"w_{stage}"] = w.astype(jnp.bfloat16)
        prepped[f"b_{stage}"] = jnp.asarray(params[f"b_{stage}"], jnp.float32)
    prepped["w_fc"] = jnp.asarray(params["w_fc"], jnp.float32)
    prepped["b_fc"] = jnp.asarray(params["b_fc"], jnp.float32)
    return prepped


# ----------------------------------------------------------------------------
# Encoder head forward (everything after the realnet backbone)
# ----------------------------------------------------------------------------
def encoder_features(v1_out, v2_out, v4_out, it_out, prepped):
    n = v1_out.shape[0]
    v1_f = pallas_linear_bf16(v1_out.reshape(n, -1),
                              prepped["w_v1"], prepped["b_v1"], apply_relu=True)
    v2_f = pallas_linear_bf16(v2_out.reshape(n, -1),
                              prepped["w_v2"], prepped["b_v2"], apply_relu=True)
    v4_f = pallas_linear_bf16(v4_out.reshape(n, -1),
                              prepped["w_v4"], prepped["b_v4"], apply_relu=True)
    it_f = pallas_linear_bf16(it_out.reshape(n, -1),
                              prepped["w_it"], prepped["b_it"], apply_relu=True)
    features = jnp.concatenate([v1_f, v2_f, v4_f, it_f], axis=1)  # (N, 512)
    # Final FC is tiny (K=512, Nout=n_output): plain JAX, no pallas_call.
    return features @ prepped["w_fc"].T + prepped["b_fc"][None, :]


# ----------------------------------------------------------------------------
# Pure-JAX f32 reference for correctness checking
# ----------------------------------------------------------------------------
def _reference(v1_out, v2_out, v4_out, it_out, params):
    def lin(x, w, b, relu):
        y = x @ w.T + b
        return jnp.maximum(y, 0.0) if relu else y

    n = v1_out.shape[0]
    features = jnp.concatenate([
        lin(v1_out.reshape(n, -1), params["w_v1"], params["b_v1"], True),
        lin(v2_out.reshape(n, -1), params["w_v2"], params["b_v2"], True),
        lin(v4_out.reshape(n, -1), params["w_v4"], params["b_v4"], True),
        lin(it_out.reshape(n, -1), params["w_it"], params["b_it"], True),
    ], axis=1)
    return lin(features, params["w_fc"], params["b_fc"], False)


if __name__ == "__main__":
    key = jax.random.PRNGKey(0)
    keys = jax.random.split(key, 16)

    # Small stand-in stage outputs (batch=2) mirroring V1/V2/V4/IT shapes of
    # the real model (channels doubling, spatial halving).
    N = 2
    n_output = 32
    v1_out = jax.random.normal(keys[0], (N, 4, 16, 16), dtype=jnp.float32)   # K=1024
    v2_out = jax.random.normal(keys[1], (N, 8, 8, 8), dtype=jnp.float32)     # K=512
    v4_out = jax.random.normal(keys[2], (N, 16, 4, 4), dtype=jnp.float32)    # K=256
    it_out = jax.random.normal(keys[3], (N, 32, 2, 2), dtype=jnp.float32)    # K=128

    def w_init(k, shape):
        return 0.05 * jax.random.normal(k, shape, dtype=jnp.float32)

    params = {
        "w_v1": w_init(keys[4], (128, 4 * 16 * 16)), "b_v1": w_init(keys[5], (128,)),
        "w_v2": w_init(keys[6], (128, 8 * 8 * 8)),   "b_v2": w_init(keys[7], (128,)),
        "w_v4": w_init(keys[8], (128, 16 * 4 * 4)),  "b_v4": w_init(keys[9], (128,)),
        "w_it": w_init(keys[10], (128, 32 * 2 * 2)), "b_it": w_init(keys[11], (128,)),
        "w_fc": w_init(keys[12], (n_output, 512)),   "b_fc": w_init(keys[13], (n_output,)),
    }

    # One-time weight conversion, OUTSIDE the jitted forward.
    prepped = prepare_params(params)

    fwd = jax.jit(encoder_features)
    feats = fwd(v1_out, v2_out, v4_out, it_out, prepped)
    feats = jax.block_until_ready(feats)

    ref = _reference(v1_out, v2_out, v4_out, it_out, params)
    assert feats.shape == (N, n_output), feats.shape
    # Tolerance loosened vs the f32 reference because x/W are streamed as bf16
    # (accumulation stays f32).
    assert jnp.allclose(feats, ref, rtol=5e-2, atol=1e-1), (
        float(jnp.max(jnp.abs(feats - ref))))
    print("KERNEL_OK")
</pallas_src>

<mosaic_0001>
module attributes {stable_mosaic.version = 11 : i64} {
  func.func @_linear_accum_kernel(%arg0: i32, %arg1: i32, %arg2: memref<2x256xbf16, #tpu.memory_space<vmem>>, %arg3: memref<128x256xbf16, #tpu.memory_space<vmem>>, %arg4: memref<1x2x128xf32, #tpu.memory_space<vmem>>) attributes {dimension_semantics = [#tpu.dimension_semantics<parallel>, #tpu.dimension_semantics<arbitrary>], iteration_bounds = array<i64: 1, 1>, scalar_prefetch = 0 : i64, scratch_operands = 0 : i64, tpu.core_type = #tpu.core_type<tc>, window_params = [{transform_indices = @transform_0, window_bounds = array<i64: 2, 256>}, {transform_indices = @transform_1, window_bounds = array<i64: 128, 256>}, {transform_indices = @transform_2, window_bounds = array<i64: 1, 2, 128>}]} {
    %c0_i32 = arith.constant 0 : i32
    %0 = arith.cmpi eq, %arg1, %c0_i32 : i32
    %1 = arith.extui %0 : i1 to i32
    %c0_i32_0 = arith.constant 0 : i32
    %2 = arith.cmpi ne, %1, %c0_i32_0 : i32
    scf.if %2 {
      %cst_10 = arith.constant 0.000000e+00 : f32
      %12 = vector.broadcast %cst_10 : f32 to vector<2x128xf32>
      %c0_11 = arith.constant 0 : index
      %c0_12 = arith.constant 0 : index
      %c0_13 = arith.constant 0 : index
      %13 = vector.load %arg4[%c0_11, %c0_12, %c0_13] : memref<1x2x128xf32, #tpu.memory_space<vmem>>, vector<1x2x128xf32>
      %14 = vector.shape_cast %13 : vector<1x2x128xf32> to vector<2x128xf32>
      %15 = vector.shape_cast %12 : vector<2x128xf32> to vector<1x2x128xf32>
      tpu.vector_store %arg4[%c0_11, %c0_12, %c0_13], %15 {strides = array<i32>} : memref<1x2x128xf32, #tpu.memory_space<vmem>>, vector<1x2x128xf32>,
    } else {
    }
    %c0 = arith.constant 0 : index
    %c0_1 = arith.constant 0 : index
    %c0_2 = arith.constant 0 : index
    %3 = vector.load %arg4[%c0, %c0_1, %c0_2] : memref<1x2x128xf32, #tpu.memory_space<vmem>>, vector<1x2x128xf32>
    %4 = vector.shape_cast %3 : vector<1x2x128xf32> to vector<2x128xf32>
    %c0_3 = arith.constant 0 : index
    %c0_4 = arith.constant 0 : index
    %5 = vector.load %arg2[%c0_3, %c0_4] : memref<2x256xbf16, #tpu.memory_space<vmem>>, vector<2x256xbf16>
    %c0_5 = arith.constant 0 : index
    %c0_6 = arith.constant 0 : index
    %6 = vector.load %arg3[%c0_5, %c0_6] : memref<128x256xbf16, #tpu.memory_space<vmem>>, vector<128x256xbf16>
    %cst = arith.constant dense<0.000000e+00> : vector<2x128xf32>
    %7 = tpu.matmul %5, %6, %cst {dimension_numbers = #tpu.dot_dimension_numbers<[1], [1], [0], [0], [0, 0, 1, 0], [], []>} : vector<2x256xbf16>, vector<128x256xbf16>, vector<2x128xf32> -> vector<2x128xf32>
    %8 = arith.addf %4, %7 : vector<2x128xf32>
    %c0_7 = arith.constant 0 : index
    %c0_8 = arith.constant 0 : index
    %c0_9 = arith.constant 0 : index
    %9 = vector.load %arg4[%c0_7, %c0_8, %c0_9] : memref<1x2x128xf32, #tpu.memory_space<vmem>>, vector<1x2x128xf32>
    %10 = vector.shape_cast %9 : vector<1x2x128xf32> to vector<2x128xf32>
    %11 = vector.shape_cast %8 : vector<2x128xf32> to vector<1x2x128xf32>
    tpu.vector_store %arg4[%c0_7, %c0_8, %c0_9], %11 {strides = array<i32>} : memref<1x2x128xf32, #tpu.memory_space<vmem>>, vector<1x2x128xf32>,
    return
  }
  func.func @transform_0(%arg0: i32, %arg1: i32) -> (i32, i32) {
    %c1_i32 = arith.constant 1 : i32
    %0 = arith.muli %arg0, %c1_i32 : i32
    %1 = arith.addi %0, %arg1 : i32
    %c0_i32 = arith.constant 0 : i32
    %c0_i32_0 = arith.constant 0 : i32
    return %c0_i32, %1 : i32, i32
  }
  func.func @transform_1(%arg0: i32, %arg1: i32) -> (i32, i32) {
    %c1_i32 = arith.constant 1 : i32
    %0 = arith.muli %arg0, %c1_i32 : i32
    %1 = arith.addi %0, %arg1 : i32
    %c0_i32 = arith.constant 0 : i32
    %c0_i32_0 = arith.constant 0 : i32
    return %c0_i32, %1 : i32, i32
  }
  func.func @transform_2(%arg0: i32, %arg1: i32) -> (i32, i32, i32) {
    %c0_i32 = arith.constant 0 : i32
    %c0_i32_0 = arith.constant 0 : i32
    %c0_i32_1 = arith.constant 0 : i32
    return %arg0, %c0_i32, %c0_i32_0 : i32, i32, i32
  }
}

module attributes {stable_mosaic.version = 11 : i64} {
  func.func @_linear_accum_kernel(%arg0: i32, %arg1: i32, %arg2: memref<2x128xbf16, #tpu.memory_space<vmem>>, %arg3: memref<128x128xbf16, #tpu.memory_space<vmem>>, %arg4: memref<1x2x128xf32, #tpu.memory_space<vmem>>) attributes {dimension_semantics = [#tpu.dimension_semantics<parallel>, #tpu.dimension_semantics<arbitrary>], iteration_bounds = array<i64: 1, 1>, scalar_prefetch = 0 : i64, scratch_operands = 0 : i64, tpu.core_type = #tpu.core_type<tc>, window_params = [{transform_indices = @transform_0, window_bounds = array<i64: 2, 128>}, {transform_indices = @transform_1, window_bounds = array<i64: 128, 128>}, {transform_indices = @transform_2, window_bounds = array<i64: 1, 2, 128>}]} {
    %c0_i32 = arith.constant 0 : i32
    %0 = arith.cmpi eq, %arg1, %c0_i32 : i32
    %1 = arith.extui %0 : i1 to i32
    %c0_i32_0 = arith.constant 0 : i32
    %2 = arith.cmpi ne, %1, %c0_i32_0 : i32
    scf.if %2 {
      %cst_10 = arith.constant 0.000000e+00 : f32
      %12 = vector.broadcast %cst_10 : f32 to vector<2x128xf32>
      %c0_11 = arith.constant 0 : index
      %c0_12 = arith.constant 0 : index
      %c0_13 = arith.constant 0 : index
      %13 = vector.load %arg4[%c0_11, %c0_12, %c0_13] : memref<1x2x128xf32, #tpu.memory_space<vmem>>, vector<1x2x128xf32>
      %14 = vector.shape_cast %13 : vector<1x2x128xf32> to vector<2x128xf32>
      %15 = vector.shape_cast %12 : vector<2x128xf32> to vector<1x2x128xf32>
      tpu.vector_store %arg4[%c0_11, %c0_12, %c0_13], %15 {strides = array<i32>} : memref<1x2x128xf32, #tpu.memory_space<vmem>>, vector<1x2x128xf32>,
    } else {
    }
    %c0 = arith.constant 0 : index
    %c0_1 = arith.constant 0 : index
    %c0_2 = arith.constant 0 : index
    %3 = vector.load %arg4[%c0, %c0_1, %c0_2] : memref<1x2x128xf32, #tpu.memory_space<vmem>>, vector<1x2x128xf32>
    %4 = vector.shape_cast %3 : vector<1x2x128xf32> to vector<2x128xf32>
    %c0_3 = arith.constant 0 : index
    %c0_4 = arith.constant 0 : index
    %5 = vector.load %arg2[%c0_3, %c0_4] : memref<2x128xbf16, #tpu.memory_space<vmem>>, vector<2x128xbf16>
    %c0_5 = arith.constant 0 : index
    %c0_6 = arith.constant 0 : index
    %6 = vector.load %arg3[%c0_5, %c0_6] : memref<128x128xbf16, #tpu.memory_space<vmem>>, vector<128x128xbf16>
    %cst = arith.constant dense<0.000000e+00> : vector<2x128xf32>
    %7 = tpu.matmul %5, %6, %cst {dimension_numbers = #tpu.dot_dimension_numbers<[1], [1], [0], [0], [0, 0, 1, 0], [], []>} : vector<2x128xbf16>, vector<128x128xbf16>, vector<2x128xf32> -> vector<2x128xf32>
    %8 = arith.addf %4, %7 : vector<2x128xf32>
    %c0_7 = arith.constant 0 : index
    %c0_8 = arith.constant 0 : index
    %c0_9 = arith.constant 0 : index
    %9 = vector.load %arg4[%c0_7, %c0_8, %c0_9] : memref<1x2x128xf32, #tpu.memory_space<vmem>>, vector<1x2x128xf32>
    %10 = vector.shape_cast %9 : vector<1x2x128xf32> to vector<2x128xf32>
    %11 = vector.shape_cast %8 : vector<2x128xf32> to vector<1x2x128xf32>
    tpu.vector_store %arg4[%c0_7, %c0_8, %c0_9], %11 {strides = array<i32>} : memref<1x2x128xf32, #tpu.memory_space<vmem>>, vector<1x2x128xf32>,
    return
  }
  func.func @transform_0(%arg0: i32, %arg1: i32) -> (i32, i32) {
    %c1_i32 = arith.constant 1 : i32
    %0 = arith.muli %arg0, %c1_i32 : i32
    %1 = arith.addi %0, %arg1 : i32
    %c0_i32 = arith.constant 0 : i32
    %c0_i32_0 = arith.constant 0 : i32
    return %c0_i32, %1 : i32, i32
  }
  func.func @transform_1(%arg0: i32, %arg1: i32) -> (i32, i32) {
    %c1_i32 = arith.constant 1 : i32
    %0 = arith.muli %arg0, %c1_i32 : i32
    %1 = arith.addi %0, %arg1 : i32
    %c0_i32 = arith.constant 0 : i32
    %c0_i32_0 = arith.constant 0 : i32
    return %c0_i32, %1 : i32, i32
  }
  func.func @transform_2(%arg0: i32, %arg1: i32) -> (i32, i32, i32) {
    %c0_i32 = arith.constant 0 : i32
    %c0_i32_0 = arith.constant 0 : i32
    %c0_i32_1 = arith.constant 0 : i32
    return %arg0, %c0_i32, %c0_i32_0 : i32, i32, i32
  }
}

module attributes {stable_mosaic.version = 11 : i64} {
  func.func @_linear_accum_kernel(%arg0: i32, %arg1: i32, %arg2: memref<2x1024xbf16, #tpu.memory_space<vmem>>, %arg3: memref<128x1024xbf16, #tpu.memory_space<vmem>>, %arg4: memref<1x2x128xf32, #tpu.memory_space<vmem>>) attributes {dimension_semantics = [#tpu.dimension_semantics<parallel>, #tpu.dimension_semantics<arbitrary>], iteration_bounds = array<i64: 1, 1>, scalar_prefetch = 0 : i64, scratch_operands = 0 : i64, tpu.core_type = #tpu.core_type<tc>, window_params = [{transform_indices = @transform_0, window_bounds = array<i64: 2, 1024>}, {transform_indices = @transform_1, window_bounds = array<i64: 128, 1024>}, {transform_indices = @transform_2, window_bounds = array<i64: 1, 2, 128>}]} {
    %c0_i32 = arith.constant 0 : i32
    %0 = arith.cmpi eq, %arg1, %c0_i32 : i32
    %1 = arith.extui %0 : i1 to i32
    %c0_i32_0 = arith.constant 0 : i32
    %2 = arith.cmpi ne, %1, %c0_i32_0 : i32
    scf.if %2 {
      %cst_10 = arith.constant 0.000000e+00 : f32
      %12 = vector.broadcast %cst_10 : f32 to vector<2x128xf32>
      %c0_11 = arith.constant 0 : index
      %c0_12 = arith.constant 0 : index
      %c0_13 = arith.constant 0 : index
      %13 = vector.load %arg4[%c0_11, %c0_12, %c0_13] : memref<1x2x128xf32, #tpu.memory_space<vmem>>, vector<1x2x128xf32>
      %14 = vector.shape_cast %13 : vector<1x2x128xf32> to vector<2x128xf32>
      %15 = vector.shape_cast %12 : vector<2x128xf32> to vector<1x2x128xf32>
      tpu.vector_store %arg4[%c0_11, %c0_12, %c0_13], %15 {strides = array<i32>} : memref<1x2x128xf32, #tpu.memory_space<vmem>>, vector<1x2x128xf32>,
    } else {
    }
    %c0 = arith.constant 0 : index
    %c0_1 = arith.constant 0 : index
    %c0_2 = arith.constant 0 : index
    %3 = vector.load %arg4[%c0, %c0_1, %c0_2] : memref<1x2x128xf32, #tpu.memory_space<vmem>>, vector<1x2x128xf32>
    %4 = vector.shape_cast %3 : vector<1x2x128xf32> to vector<2x128xf32>
    %c0_3 = arith.constant 0 : index
    %c0_4 = arith.constant 0 : index
    %5 = vector.load %arg2[%c0_3, %c0_4] : memref<2x1024xbf16, #tpu.memory_space<vmem>>, vector<2x1024xbf16>
    %c0_5 = arith.constant 0 : index
    %c0_6 = arith.constant 0 : index
    %6 = vector.load %arg3[%c0_5, %c0_6] : memref<128x1024xbf16, #tpu.memory_space<vmem>>, vector<128x1024xbf16>
    %cst = arith.constant dense<0.000000e+00> : vector<2x128xf32>
    %7 = tpu.matmul %5, %6, %cst {dimension_numbers = #tpu.dot_dimension_numbers<[1], [1], [0], [0], [0, 0, 1, 0], [], []>} : vector<2x1024xbf16>, vector<128x1024xbf16>, vector<2x128xf32> -> vector<2x128xf32>
    %8 = arith.addf %4, %7 : vector<2x128xf32>
    %c0_7 = arith.constant 0 : index
    %c0_8 = arith.constant 0 : index
    %c0_9 = arith.constant 0 : index
    %9 = vector.load %arg4[%c0_7, %c0_8, %c0_9] : memref<1x2x128xf32, #tpu.memory_space<vmem>>, vector<1x2x128xf32>
    %10 = vector.shape_cast %9 : vector<1x2x128xf32> to vector<2x128xf32>
    %11 = vector.shape_cast %8 : vector<2x128xf32> to vector<1x2x128xf32>
    tpu.vector_store %arg4[%c0_7, %c0_8, %c0_9], %11 {strides = array<i32>} : memref<1x2x128xf32, #tpu.memory_space<vmem>>, vector<1x2x128xf32>,
    return
  }
  func.func @transform_0(%arg0: i32, %arg1: i32) -> (i32, i32) {
    %c1_i32 = arith.constant 1 : i32
    %0 = arith.muli %arg0, %c1_i32 : i32
    %1 = arith.addi %0, %arg1 : i32
    %c0_i32 = arith.constant 0 : i32
    %c0_i32_0 = arith.constant 0 : i32
    return %c0_i32, %1 : i32, i32
  }
  func.func @transform_1(%arg0: i32, %arg1: i32) -> (i32, i32) {
    %c1_i32 = arith.constant 1 : i32
    %0 = arith.muli %arg0, %c1_i32 : i32
    %1 = arith.addi %0, %arg1 : i32
    %c0_i32 = arith.constant 0 : i32
    %c0_i32_0 = arith.constant 0 : i32
    return %c0_i32, %1 : i32, i32
  }
  func.func @transform_2(%arg0: i32, %arg1: i32) -> (i32, i32, i32) {
    %c0_i32 = arith.constant 0 : i32
    %c0_i32_0 = arith.constant 0 : i32
    %c0_i32_1 = arith.constant 0 : i32
    return %arg0, %c0_i32, %c0_i32_0 : i32, i32, i32
  }
}

module attributes {stable_mosaic.version = 11 : i64} {
  func.func @_linear_accum_kernel(%arg0: i32, %arg1: i32, %arg2: memref<2x512xbf16, #tpu.memory_space<vmem>>, %arg3: memref<128x512xbf16, #tpu.memory_space<vmem>>, %arg4: memref<1x2x128xf32, #tpu.memory_space<vmem>>) attributes {dimension_semantics = [#tpu.dimension_semantics<parallel>, #tpu.dimension_semantics<arbitrary>], iteration_bounds = array<i64: 1, 1>, scalar_prefetch = 0 : i64, scratch_operands = 0 : i64, tpu.core_type = #tpu.core_type<tc>, window_params = [{transform_indices = @transform_0, window_bounds = array<i64: 2, 512>}, {transform_indices = @transform_1, window_bounds = array<i64: 128, 512>}, {transform_indices = @transform_2, window_bounds = array<i64: 1, 2, 128>}]} {
    %c0_i32 = arith.constant 0 : i32
    %0 = arith.cmpi eq, %arg1, %c0_i32 : i32
    %1 = arith.extui %0 : i1 to i32
    %c0_i32_0 = arith.constant 0 : i32
    %2 = arith.cmpi ne, %1, %c0_i32_0 : i32
    scf.if %2 {
      %cst_10 = arith.constant 0.000000e+00 : f32
      %12 = vector.broadcast %cst_10 : f32 to vector<2x128xf32>
      %c0_11 = arith.constant 0 : index
      %c0_12 = arith.constant 0 : index
      %c0_13 = arith.constant 0 : index
      %13 = vector.load %arg4[%c0_11, %c0_12, %c0_13] : memref<1x2x128xf32, #tpu.memory_space<vmem>>, vector<1x2x128xf32>
      %14 = vector.shape_cast %13 : vector<1x2x128xf32> to vector<2x128xf32>
      %15 = vector.shape_cast %12 : vector<2x128xf32> to vector<1x2x128xf32>
      tpu.vector_store %arg4[%c0_11, %c0_12, %c0_13], %15 {strides = array<i32>} : memref<1x2x128xf32, #tpu.memory_space<vmem>>, vector<1x2x128xf32>,
    } else {
    }
    %c0 = arith.constant 0 : index
    %c0_1 = arith.constant 0 : index
    %c0_2 = arith.constant 0 : index
    %3 = vector.load %arg4[%c0, %c0_1, %c0_2] : memref<1x2x128xf32, #tpu.memory_space<vmem>>, vector<1x2x128xf32>
    %4 = vector.shape_cast %3 : vector<1x2x128xf32> to vector<2x128xf32>
    %c0_3 = arith.constant 0 : index
    %c0_4 = arith.constant 0 : index
    %5 = vector.load %arg2[%c0_3, %c0_4] : memref<2x512xbf16, #tpu.memory_space<vmem>>, vector<2x512xbf16>
    %c0_5 = arith.constant 0 : index
    %c0_6 = arith.constant 0 : index
    %6 = vector.load %arg3[%c0_5, %c0_6] : memref<128x512xbf16, #tpu.memory_space<vmem>>, vector<128x512xbf16>
    %cst = arith.constant dense<0.000000e+00> : vector<2x128xf32>
    %7 = tpu.matmul %5, %6, %cst {dimension_numbers = #tpu.dot_dimension_numbers<[1], [1], [0], [0], [0, 0, 1, 0], [], []>} : vector<2x512xbf16>, vector<128x512xbf16>, vector<2x128xf32> -> vector<2x128xf32>
    %8 = arith.addf %4, %7 : vector<2x128xf32>
    %c0_7 = arith.constant 0 : index
    %c0_8 = arith.constant 0 : index
    %c0_9 = arith.constant 0 : index
    %9 = vector.load %arg4[%c0_7, %c0_8, %c0_9] : memref<1x2x128xf32, #tpu.memory_space<vmem>>, vector<1x2x128xf32>
    %10 = vector.shape_cast %9 : vector<1x2x128xf32> to vector<2x128xf32>
    %11 = vector.shape_cast %8 : vector<2x128xf32> to vector<1x2x128xf32>
    tpu.vector_store %arg4[%c0_7, %c0_8, %c0_9], %11 {strides = array<i32>} : memref<1x2x128xf32, #tpu.memory_space<vmem>>, vector<1x2x128xf32>,
    return
  }
  func.func @transform_0(%arg0: i32, %arg1: i32) -> (i32, i32) {
    %c1_i32 = arith.constant 1 : i32
    %0 = arith.muli %arg0, %c1_i32 : i32
    %1 = arith.addi %0, %arg1 : i32
    %c0_i32 = arith.constant 0 : i32
    %c0_i32_0 = arith.constant 0 : i32
    return %c0_i32, %1 : i32, i32
  }
  func.func @transform_1(%arg0: i32, %arg1: i32) -> (i32, i32) {
    %c1_i32 = arith.constant 1 : i32
    %0 = arith.muli %arg0, %c1_i32 : i32
    %1 = arith.addi %0, %arg1 : i32
    %c0_i32 = arith.constant 0 : i32
    %c0_i32_0 = arith.constant 0 : i32
    return %c0_i32, %1 : i32, i32
  }
  func.func @transform_2(%arg0: i32, %arg1: i32) -> (i32, i32, i32) {
    %c0_i32 = arith.constant 0 : i32
    %c0_i32_0 = arith.constant 0 : i32
    %c0_i32_1 = arith.constant 0 : i32
    return %arg0, %c0_i32, %c0_i32_0 : i32, i32, i32
  }
}

</mosaic_0001>

<bundles_post_ra>
// kernel: encoder_features.6
= control target key start
LH: loop header
LB: loop body
LE: loop exit
PB: predicated region body
PF: predicated region fallthrough
CT: control target
= control target key end

     0   :  { %v279_v1 = vmov 0.0   ;;  %v280_v4 = vmov 1966171168   ;;  %v88_v6 = vlaneseq  ;;  %s356_s1 = inlined_call_operand.vmem [shape: bf16[128,256], index: 1, kind: input, shape index: {}]   ;;  %s357_s2 = inlined_call_operand.vmem [shape: f32[1,2,128], index: 2, kind: output, shape index: {}]   ;;  %s358_s0 = inlined_call_operand.vmem [shape: bf16[2,256], index: 0, kind: input, shape index: {}]  }
   0x1   :  { %v255_v0 = vld [vmem:[%s356_s1 + $0x74] ss:$8 sps:$4 sm:$0xff]   ;;  %57 = vst [vmem:[%s357_s2] sm:$0x3] %v279_v1  ;;  %v257_v2 = vld [vmem:[%s356_s1 + $0x70] ss:$8 sps:$4 sm:$0xff]   ;;  %v86_v5 = vunpack.c.l.s4 %v280_v4 }
   0x2   :  { %181 = vmatprep.subr.bf16.mxu0 %v255_v0  ;;  %v258_v3 = vld [vmem:[%s356_s1 + $0x64] ss:$8 sps:$4 sm:$0xff]   ;;  %v89_v8 = vshrl.u32 %v88_v6, 7  ;;  %v260_v9 = vld [vmem:[%s356_s1 + $0x60] ss:$8 sps:$4 sm:$0xff]  }
   0x3   :  { %182 = vmatpush1.bf16.xpose.msra.mxu0 %v257_v2  ;;  %v87_v7 = vunpack.c.0.s8 %v86_v5  ;;  %v261_v10 = vld [vmem:[%s356_s1 + $0x54] ss:$8 sps:$4 sm:$0xff]   ;;  %v236_v12 = vld.sshfl [vmem:[%s358_s0] sm:$0x11 pattern:$0x75316420] }
   0x4   :  { %183 = vmatprep.subr.bf16.mxu0 %v258_v3  ;;  %v84_v13 = vcombine.high %v236_v12, %v236_v12  ;;  %v263_v15 = vld [vmem:[%s356_s1 + $0x50] ss:$8 sps:$4 sm:$0xff]   ;;  %v264_v16 = vld [vmem:[%s356_s1 + $0x44] ss:$8 sps:$4 sm:$0xff]   ;;  %v266_v17 = vld [vmem:[%s356_s1 + $0x40] ss:$8 sps:$4 sm:$0xff]  }
   0x5   :  { %v90_v11 = vsub.s32 %v87_v7, %v89_v8  ;;  %v267_v18 = vld [vmem:[%s356_s1 + $0x34] ss:$8 sps:$4 sm:$0xff]   ;;  %v269_v19 = vld [vmem:[%s356_s1 + $0x30] ss:$8 sps:$4 sm:$0xff]   ;;  %v270_v20 = vld [vmem:[%s356_s1 + $0x24] ss:$8 sps:$4 sm:$0xff]  }
   0x6   :  { %v272_v21 = vld [vmem:[%s356_s1 + $0x20] ss:$8 sps:$4 sm:$0xff]   ;;  %v273_v22 = vld [vmem:[%s356_s1 + $0x14] ss:$8 sps:$4 sm:$0xff]   ;;  %v275_v23 = vld [vmem:[%s356_s1 + $0x10] ss:$8 sps:$4 sm:$0xff]  }
   0x7   :  { %v98_v14 = vrot.slane %v84_v13, %v90_v11  ;;  %v276_v24 = vld [vmem:[%s356_s1 + $0x4] ss:$8 sps:$4 sm:$0xff]   ;;  %v278_v25 = vld [vmem:[%s356_s1] ss:$8 sps:$4 sm:$0xff]   ;;  %v91_v26 = vrot.slane %v236_v12, %v90_v11 }
   0x8   :  { %v58_v27 = vld [vmem:[%s357_s2] sm:$0x3] }
   0x9   :  { %213 = vmatprep.mubr.bf16.mxu0 %v98_v14 }
   0xb   :  { %184 = vmatpush1.bf16.xpose.msra.mxu0 %v260_v9 }
   0xc   :  { %185 = vmatprep.subr.bf16.mxu0 %v261_v10 }
  0x13   :  { %186 = vmatpush1.bf16.xpose.msra.mxu0 %v263_v15 }
  0x14   :  { %187 = vmatprep.subr.bf16.mxu0 %v264_v16 }
  0x1b   :  { %188 = vmatpush1.bf16.xpose.msra.mxu0 %v266_v17 }
  0x1c   :  { %189 = vmatprep.subr.bf16.mxu0 %v267_v18 }
  0x23   :  { %190 = vmatpush1.bf16.xpose.msra.mxu0 %v269_v19 }
  0x24   :  { %191 = vmatprep.subr.bf16.mxu0 %v270_v20 }
  0x2b   :  { %192 = vmatpush1.bf16.xpose.msra.mxu0 %v272_v21 }
  0x2c   :  { %193 = vmatprep.subr.bf16.mxu0 %v273_v22 }
  0x33   :  { %194 = vmatpush1.bf16.xpose.msra.mxu0 %v275_v23 }
  0x34   :  { %195 = vmatprep.subr.bf16.mxu0 %v276_v24 }
  0x3b   :  { %196 = vmatpush1.bf16.xpose.msra.mxu0 %v278_v25 }
  0x42   :  { %214 = vmatmul.mubr.bf16.vlgmr.msra.gmra.mxu0 %v91_v26 }
 0x102   :  { %v215_v28 = vpop.f32.mrf.mxu0 }
 0x103   :  { %v221_v29 = vadd.f32 %v215_v28, %v58_v27 }
 0x104   :  { %v217_v30 = vpop.f32.mrf.mxu0 }
 0x105   :  { %222 = vst [vmem:[%s357_s2] sm:$0x3] %v221_v29 }
 0x106   :  { %v218_v31 = vpop.f32.mrf.mxu0 }
 0x108   :  { %v219_v32 = vpop.f32.mrf.mxu0 }

// kernel: encoder_features.7
= control target key start
LH: loop header
LB: loop body
LE: loop exit
PB: predicated region body
PF: predicated region fallthrough
CT: control target
= control target key end

     0   :  { %v216_v0 = vmov 0.0   ;;  %vm217_vm0 = vmmov 0   ;;  %s269_s1 = inlined_call_operand.vmem [shape: bf16[128,128], index: 1, kind: input, shape index: {}]   ;;  %s270_s2 = inlined_call_operand.vmem [shape: f32[1,2,128], index: 2, kind: output, shape index: {}]   ;;  %s271_s0 = inlined_call_operand.vmem [shape: bf16[2,128], index: 0, kind: input, shape index: {}]  }
   0x1   :  { %186 = vmatprep.subr.bf16.mxu0 %v216_v0  ;;  %v208_v1 = vld [vmem:[%s269_s1 + $0x38] sm:$0xff]   ;;  %202 = vmatprep.mubr.msk.bf16.mxu0 %vm217_vm0, %v216_v0  ;;  %47 = vst [vmem:[%s270_s2] sm:$0x3] %v216_v0  ;;  %v209_v2 = vld [vmem:[%s269_s1 + $0x30] sm:$0xff]   ;;  %v210_v3 = vld [vmem:[%s269_s1 + $0x28] sm:$0xff]  }
   0x2   :  { %187 = vmatpush3.bf16.xpose.msra.mxu0 %v208_v1  ;;  %v211_v4 = vld [vmem:[%s269_s1 + $0x20] sm:$0xff]   ;;  %v212_v5 = vld [vmem:[%s269_s1 + $0x18] sm:$0xff]   ;;  %v213_v6 = vld [vmem:[%s269_s1 + $0x10] sm:$0xff]  }
   0x3   :  { %188 = vmatprep.subr.bf16.mxu0 %v216_v0  ;;  %v214_v7 = vld [vmem:[%s269_s1 + $0x8] sm:$0xff]   ;;  %v215_v8 = vld [vmem:[%s269_s1] sm:$0xff]  }
   0x4   :  { %v49_v9 = vld [vmem:[%s271_s0] sm:$0x1] }
   0x8   :  { %v48_v10 = vld [vmem:[%s270_s2] sm:$0x3] }
   0xa   :  { %189 = vmatpush3.bf16.xpose.msra.mxu0 %v209_v2 }
   0xb   :  { %190 = vmatprep.subr.bf16.mxu0 %v216_v0 }
  0x12   :  { %191 = vmatpush3.bf16.xpose.msra.mxu0 %v210_v3 }
  0x13   :  { %192 = vmatprep.subr.bf16.mxu0 %v216_v0 }
  0x1a   :  { %193 = vmatpush3.bf16.xpose.msra.mxu0 %v211_v4 }
  0x1b   :  { %194 = vmatprep.subr.bf16.mxu0 %v216_v0 }
  0x22   :  { %195 = vmatpush3.bf16.xpose.msra.mxu0 %v212_v5 }
  0x23   :  { %196 = vmatprep.subr.bf16.mxu0 %v216_v0 }
  0x2a   :  { %197 = vmatpush3.bf16.xpose.msra.mxu0 %v213_v6 }
  0x2b   :  { %198 = vmatprep.subr.bf16.mxu0 %v216_v0 }
  0x32   :  { %199 = vmatpush3.bf16.xpose.msra.mxu0 %v214_v7 }
  0x33   :  { %200 = vmatprep.subr.bf16.mxu0 %v216_v0 }
  0x3a   :  { %201 = vmatpush3.bf16.xpose.msra.mxu0 %v215_v8 }
  0x41   :  { %203 = vmatmul.mubr.bf16.vlgmr.msra.gmra.mxu0 %v49_v9 }
 0x101   :  { %v148_v11 = vpop.f32.mrf.mxu0 }
 0x102   :  { %v154_v12 = vadd.f32 %v148_v11, %v48_v10 }
 0x103   :  { %v204_v13 = vpop.f32.mrf.mxu0 }
 0x104   :  { %155 = vst [vmem:[%s270_s2] sm:$0x3] %v154_v12 }
 0x105   :  { %v151_v14 = vpop.f32.mrf.mxu0 }
 0x107   :  { %v205_v15 = vpop.f32.mrf.mxu0 }

// kernel: encoder_features.4
= control target key start
LH: loop header
LB: loop body
LE: loop exit
PB: predicated region body
PF: predicated region fallthrough
CT: control target
= control target key end

     0   :  { %v129_v0 = vlaneseq  ;;  %v744_v4 = vmov 1966171168   ;;  %s988_s1 = inlined_call_operand.vmem [shape: bf16[128,1024], index: 1, kind: input, shape index: {}]   ;;  %s989_s0 = inlined_call_operand.vmem [shape: bf16[2,1024], index: 0, kind: input, shape index: {}]   ;;  %s990_s2 = inlined_call_operand.vmem [shape: f32[1,2,128], index: 2, kind: output, shape index: {}]  }
   0x1   :  { %v116_v1 = vld [vmem:[%s988_s1 + $0x1c0] sm:$0xff]  ;;  %v117_v3 = vld [vmem:[%s988_s1 + $0x1c8] sm:$0xff]  ;;  %v127_v5 = vunpack.c.l.s4 %v744_v4 }
   0x2   :  { %v120_v2 = vld [vmem:[%s988_s1 + $0x1e0] sm:$0xff]  ;;  %v121_v7 = vld [vmem:[%s988_s1 + $0x1e8] sm:$0xff]  ;;  %v130_v18 = vshrl.u32 %v129_v0, 7 }
   0x3   :  { %v734_v6 = vcombine.high %v116_v1, %v120_v2  ;;  %v733_v8 = vcombine.low %v116_v1, %v120_v2  ;;  %v108_v9 = vld [vmem:[%s988_s1 + $0x180] sm:$0xff]  ;;  %v736_v11 = vcombine.high %v117_v3, %v121_v7  ;;  %v735_v12 = vcombine.low %v117_v3, %v121_v7  ;;  %v109_v14 = vld [vmem:[%s988_s1 + $0x188] sm:$0xff] }
   0x4   :  { %v112_v10 = vld [vmem:[%s988_s1 + $0x1a0] sm:$0xff]  ;;  %v113_v15 = vld [vmem:[%s988_s1 + $0x1a8] sm:$0xff]  ;;  %v128_v17 = vunpack.c.0.s8 %v127_v5 }
   0x5   :  { %v726_v13 = vcombine.high %v108_v9, %v112_v10  ;;  %502 = vmatprep.subr.bf16.mxu0 %v734_v6  ;;  %v728_v16 = vcombine.high %v109_v14, %v113_v15  ;;  %542 = vmatprep.subr.bf16.mxu1 %v736_v11  ;;  %v100_v19 = vld [vmem:[%s988_s1 + $0x140] sm:$0xff]  ;;  %v101_v21 = vld [vmem:[%s988_s1 + $0x148] sm:$0xff]  ;;  %v725_v24 = vcombine.low %v108_v9, %v112_v10 }
   0x6   :  { %503 = vmatpush1.bf16.xpose.msra.mxu0 %v733_v8  ;;  %543 = vmatpush1.bf16.xpose.msra.mxu1 %v735_v12  ;;  %v104_v20 = vld [vmem:[%s988_s1 + $0x160] sm:$0xff]  ;;  %v105_v22 = vld [vmem:[%s988_s1 + $0x168] sm:$0xff]  ;;  %v797_v23 = vsub.s32 %v128_v17, %v130_v18  ;;  %v727_v25 = vcombine.low %v109_v14, %v113_v15  ;;  %v118_v12 = vld [vmem:[%s988_s1 + $0x1d0] sm:$0xff] }
   0x7   :  { %504 = vmatprep.subr.bf16.mxu0 %v726_v13  ;;  %544 = vmatprep.subr.bf16.mxu1 %v728_v16  ;;  %v718_v26 = vcombine.high %v100_v19, %v104_v20  ;;  %v720_v27 = vcombine.high %v101_v21, %v105_v22  ;;  %v59_v28 = vld [vmem:[%s989_s0] sm:$0xff]  ;;  %v93_v33 = vld [vmem:[%s988_s1 + $0x108] sm:$0xff]  ;;  %v717_v36 = vcombine.low %v100_v19, %v104_v20  ;;  %v122_v13 = vld [vmem:[%s988_s1 + $0x1f0] sm:$0xff] }
   0x8   :  { %v803_v29 = vrot.slane %v59_v28, %v797_v23  ;;  %v92_v31 = vld [vmem:[%s988_s1 + $0x100] sm:$0xff]  ;;  %v97_v34 = vld [vmem:[%s988_s1 + $0x128] sm:$0xff]  ;;  %v719_v37 = vcombine.low %v101_v21, %v105_v22  ;;  %v125_v39 = vcombine.high %v59_v28, %v59_v28  ;;  %v119_v14 = vld [vmem:[%s988_s1 + $0x1d8] sm:$0xff]  ;;  %v738_v18 = vcombine.high %v118_v12, %v122_v13 }
   0x9   :  { %v96_v32 = vld [vmem:[%s988_s1 + $0x120] sm:$0xff]  ;;  %v712_v41 = vcombine.high %v93_v33, %v97_v34  ;;  %v85_v45 = vld [vmem:[%s988_s1 + $0xc8] sm:$0xff]  ;;  %v711_v49 = vcombine.low %v93_v33, %v97_v34  ;;  %v123_v15 = vld [vmem:[%s988_s1 + $0x1f8] sm:$0xff] }
   0xa   :  { %v140_v30 = vcombine.high %v803_v29, %v803_v29  ;;  %v710_v38 = vcombine.high %v92_v31, %v96_v32  ;;  %v821_v42 = vrot.slane %v125_v39, %v797_v23  ;;  %v84_v43 = vld [vmem:[%s988_s1 + $0xc0] sm:$0xff]  ;;  %v89_v46 = vld [vmem:[%s988_s1 + $0xe8] sm:$0xff]  ;;  %v709_v48 = vcombine.low %v92_v31, %v96_v32  ;;  %v110_v22 = vld [vmem:[%s988_s1 + $0x190] sm:$0xff] }
   0xb   :  { %v88_v44 = vld [vmem:[%s988_s1 + $0xe0] sm:$0xff]  ;;  %v704_v51 = vcombine.high %v85_v45, %v89_v46  ;;  %v77_v54 = vld [vmem:[%s988_s1 + $0x88] sm:$0xff]  ;;  %v703_v57 = vcombine.low %v85_v45, %v89_v46  ;;  %v740_v19 = vcombine.high %v119_v14, %v123_v15  ;;  %v148_v21 = vrot.slane %v803_v29, %v797_v23  ;;  %v102_v34 = vld [vmem:[%s988_s1 + $0x150] sm:$0xff] }
   0xc   :  { %v162_v35 = vrot.slane %v140_v30, %v797_v23  ;;  %v837_v47 = vrot.slane %v821_v42, %v797_v23  ;;  %v702_v50 = vcombine.high %v84_v43, %v88_v44  ;;  %v76_v52 = vld [vmem:[%s988_s1 + $0x80] sm:$0xff]  ;;  %v81_v55 = vld [vmem:[%s988_s1 + $0xa8] sm:$0xff]  ;;  %v701_v56 = vcombine.low %v84_v43, %v88_v44  ;;  %v95_v43 = vld [vmem:[%s988_s1 + $0x118] sm:$0xff] }
   0xd   :  { %v80_v53 = vld [vmem:[%s988_s1 + $0xa0] sm:$0xff]  ;;  %v696_v59 = vcombine.high %v77_v54, %v81_v55  ;;  %v69_v62 = vld [vmem:[%s988_s1 + $0x48] sm:$0xff]  ;;  %v695_v1 = vcombine.low %v77_v54, %v81_v55  ;;  %v141_v20 = vcombine.high %v821_v42, %v821_v42  ;;  %v170_v28 = vcombine.high %v148_v21, %v148_v21  ;;  %v98_v42 = vld [vmem:[%s988_s1 + $0x130] sm:$0xff] }
   0xe   :  { %505 = vmatpush1.bf16.xpose.msra.mxu0 %v725_v24  ;;  %545 = vmatpush1.bf16.xpose.msra.mxu1 %v727_v25  ;;  %v172_v40 = vcombine.high %v162_v35, %v162_v35  ;;  %v694_v58 = vcombine.high %v76_v52, %v80_v53  ;;  %v68_v60 = vld [vmem:[%s988_s1 + $0x40] sm:$0xff]  ;;  %v73_v63 = vld [vmem:[%s988_s1 + $0x68] sm:$0xff]  ;;  %v693_v0 = vcombine.low %v76_v52, %v80_v53  ;;  %v114_v24 = vld [vmem:[%s988_s1 + $0x1b0] sm:$0xff] }
   0xf   :  { %506 = vmatprep.subr.bf16.mxu0 %v718_v26  ;;  %546 = vmatprep.subr.bf16.mxu1 %v720_v27  ;;  %v72_v61 = vld [vmem:[%s988_s1 + $0x60] sm:$0xff]  ;;  %v688_v3 = vcombine.high %v69_v62, %v73_v63  ;;  %v61_v6 = vld [vmem:[%s988_s1 + $0x8] sm:$0xff]  ;;  %v687_v9 = vcombine.low %v69_v62, %v73_v63  ;;  %v111_v25 = vld [vmem:[%s988_s1 + $0x198] sm:$0xff]  ;;  %v169_v27 = vrot.slane %v141_v20, %v797_v23 }
  0x10   :  { %534 = vmatprep.mubr.bf16.mxu0 %v162_v35  ;;  %574 = vmatprep.mubr.bf16.mxu1 %v172_v40  ;;  %v686_v2 = vcombine.high %v68_v60, %v72_v61  ;;  %v60_v4 = vld [vmem:[%s988_s1] sm:$0xff]  ;;  %v65_v7 = vld [vmem:[%s988_s1 + $0x28] sm:$0xff]  ;;  %v685_v8 = vcombine.low %v68_v60, %v72_v61  ;;  %v115_v26 = vld [vmem:[%s988_s1 + $0x1b8] sm:$0xff]  ;;  %v737_v29 = vcombine.low %v118_v12, %v122_v13 }
  0x11   :  { %v64_v5 = vld [vmem:[%s988_s1 + $0x20] sm:$0xff]  ;;  %v680_v11 = vcombine.high %v61_v6, %v65_v7  ;;  %v679_v17 = vcombine.low %v61_v6, %v65_v7  ;;  %v739_v30 = vcombine.low %v119_v14, %v123_v15  ;;  %v730_v31 = vcombine.high %v110_v22, %v114_v24  ;;  %v106_v23 = vld [vmem:[%s988_s1 + $0x170] sm:$0xff]  ;;  %v103_v35 = vld [vmem:[%s988_s1 + $0x158] sm:$0xff] }
  0x12   :  { %v678_v10 = vcombine.high %v60_v4, %v64_v5  ;;  %v677_v16 = vcombine.low %v60_v4, %v64_v5  ;;  %v732_v32 = vcombine.high %v111_v25, %v115_v26  ;;  %v173_v33 = vcombine.high %v169_v27, %v169_v27  ;;  %v99_v44 = vld [vmem:[%s988_s1 + $0x138] sm:$0xff] }
  0x13   :  { %v722_v39 = vcombine.high %v102_v34, %v106_v23  ;;  %v721_v45 = vcombine.low %v102_v34, %v106_v23  ;;  %v87_v52 = vld [vmem:[%s988_s1 + $0xd8] sm:$0xff]  ;;  %v715_v55 = vcombine.low %v95_v43, %v99_v44  ;;  %v171_v20 = vcombine.high %v837_v47, %v837_v47 }
  0x14   :  { %v91_v53 = vld [vmem:[%s988_s1 + $0xf8] sm:$0xff] }
  0x15   :  { %v79_v60 = vld [vmem:[%s988_s1 + $0x98] sm:$0xff]  ;;  %v707_v63 = vcombine.low %v87_v52, %v91_v53 }
  0x16   :  { %507 = vmatpush1.bf16.xpose.msra.mxu0 %v717_v36  ;;  %547 = vmatpush1.bf16.xpose.msra.mxu1 %v719_v37  ;;  %v107_v36 = vld [vmem:[%s988_s1 + $0x178] sm:$0xff]  ;;  %v729_v37 = vcombine.low %v110_v22, %v114_v24 }
  0x17   :  { %508 = vmatprep.subr.bf16.mxu0 %v710_v38  ;;  %548 = vmatprep.subr.bf16.mxu1 %v712_v41  ;;  %v731_v38 = vcombine.low %v111_v25, %v115_v26  ;;  %v724_v40 = vcombine.high %v103_v35, %v107_v36  ;;  %v94_v41 = vld [vmem:[%s988_s1 + $0x110] sm:$0xff]  ;;  %v723_v46 = vcombine.low %v103_v35, %v107_v36  ;;  %v83_v61 = vld [vmem:[%s988_s1 + $0xb8] sm:$0xff] }
  0x18   :  { %v713_v54 = vcombine.low %v94_v41, %v98_v42  ;;  %v71_v4 = vld [vmem:[%s988_s1 + $0x58] sm:$0xff]  ;;  %v699_v7 = vcombine.low %v79_v60, %v83_v61 }
  0x19   :  { %v75_v5 = vld [vmem:[%s988_s1 + $0x78] sm:$0xff] }
  0x1a   :  { %v63_v12 = vld [vmem:[%s988_s1 + $0x18] sm:$0xff]  ;;  %v691_v15 = vcombine.low %v71_v4, %v75_v5 }
  0x1b   :  { %v67_v13 = vld [vmem:[%s988_s1 + $0x38] sm:$0xff] }
  0x1e   :  { %509 = vmatpush1.bf16.xpose.msra.mxu0 %v709_v48  ;;  %549 = vmatpush1.bf16.xpose.msra.mxu1 %v711_v49  ;;  %v714_v48 = vcombine.high %v94_v41, %v98_v42  ;;  %v716_v49 = vcombine.high %v95_v43, %v99_v44 }
  0x1f   :  { %510 = vmatprep.subr.bf16.mxu0 %v702_v50  ;;  %550 = vmatprep.subr.bf16.mxu1 %v704_v51  ;;  %v86_v50 = vld [vmem:[%s988_s1 + $0xd0] sm:$0xff] }
  0x20   :  { %v90_v51 = vld [vmem:[%s988_s1 + $0xf0] sm:$0xff] }
  0x21   :  { %v705_v62 = vcombine.low %v86_v50, %v90_v51 }
  0x26   :  { %511 = vmatpush1.bf16.xpose.msra.mxu0 %v701_v56  ;;  %551 = vmatpush1.bf16.xpose.msra.mxu1 %v703_v57  ;;  %v706_v56 = vcombine.high %v86_v50, %v90_v51  ;;  %v708_v57 = vcombine.high %v87_v52, %v91_v53 }
  0x27   :  { %512 = vmatprep.subr.bf16.mxu0 %v694_v58  ;;  %552 = vmatprep.subr.bf16.mxu1 %v696_v59  ;;  %v78_v58 = vld [vmem:[%s988_s1 + $0x90] sm:$0xff] }
  0x28   :  { %v82_v59 = vld [vmem:[%s988_s1 + $0xb0] sm:$0xff] }
  0x29   :  { %v697_v6 = vcombine.low %v78_v58, %v82_v59 }
  0x2e   :  { %513 = vmatpush1.bf16.xpose.msra.mxu0 %v693_v0  ;;  %553 = vmatpush1.bf16.xpose.msra.mxu1 %v695_v1  ;;  %v698_v0 = vcombine.high %v78_v58, %v82_v59  ;;  %v700_v1 = vcombine.high %v79_v60, %v83_v61 }
  0x2f   :  { %514 = vmatprep.subr.bf16.mxu0 %v686_v2  ;;  %554 = vmatprep.subr.bf16.mxu1 %v688_v3  ;;  %v70_v2 = vld [vmem:[%s988_s1 + $0x50] sm:$0xff] }
  0x30   :  { %v74_v3 = vld [vmem:[%s988_s1 + $0x70] sm:$0xff] }
  0x31   :  { %v689_v14 = vcombine.low %v70_v2, %v74_v3 }
  0x36   :  { %515 = vmatpush1.bf16.xpose.msra.mxu0 %v685_v8  ;;  %555 = vmatpush1.bf16.xpose.msra.mxu1 %v687_v9  ;;  %v690_v8 = vcombine.high %v70_v2, %v74_v3  ;;  %v692_v9 = vcombine.high %v71_v4, %v75_v5 }
  0x37   :  { %516 = vmatprep.subr.bf16.mxu0 %v678_v10  ;;  %556 = vmatprep.subr.bf16.mxu1 %v680_v11  ;;  %v62_v10 = vld [vmem:[%s988_s1 + $0x10] sm:$0xff] }
  0x38   :  { %v66_v11 = vld [vmem:[%s988_s1 + $0x30] sm:$0xff] }
  0x3e   :  { %517 = vmatpush1.bf16.xpose.msra.mxu0 %v677_v16  ;;  %557 = vmatpush1.bf16.xpose.msra.mxu1 %v679_v17  ;;  %v682_v16 = vcombine.high %v62_v10, %v66_v11  ;;  %v684_v17 = vcombine.high %v63_v12, %v67_v13 }
  0x3f   :  { %582 = vmatprep.subr.bf16.mxu0 %v738_v18  ;;  %622 = vmatprep.subr.bf16.mxu1 %v740_v19  ;;  %v681_v18 = vcombine.low %v62_v10, %v66_v11  ;;  %v683_v19 = vcombine.low %v63_v12, %v67_v13 }
  0x45   :  { %535 = vmatmul.mubr.bf16.vlgmr.msra.gmra.mxu0 %v148_v21  ;;  %575 = vmatmul.mubr.bf16.vlgmr.msra.gmra.mxu1 %v170_v28  ;;  %v745_v21 = vmov 0.0  }
  0x46   :  { %583 = vmatpush1.bf16.xpose.msra.mxu0 %v737_v29  ;;  %623 = vmatpush1.bf16.xpose.msra.mxu1 %v739_v30  ;;  %57 = vst [vmem:[%s990_s2] sm:$0x3] %v745_v21 }
  0x47   :  { %584 = vmatprep.subr.bf16.mxu0 %v730_v31  ;;  %624 = vmatprep.subr.bf16.mxu1 %v732_v32 }
  0x48   :  { %614 = vmatprep.mubr.bf16.mxu0 %v169_v27  ;;  %654 = vmatprep.mubr.bf16.mxu1 %v173_v33 }
  0x4e   :  { %585 = vmatpush1.bf16.xpose.msra.mxu0 %v729_v37  ;;  %625 = vmatpush1.bf16.xpose.msra.mxu1 %v731_v38 }
  0x4f   :  { %586 = vmatprep.subr.bf16.mxu0 %v722_v39  ;;  %626 = vmatprep.subr.bf16.mxu1 %v724_v40 }
  0x56   :  { %587 = vmatpush1.bf16.xpose.msra.mxu0 %v721_v45  ;;  %627 = vmatpush1.bf16.xpose.msra.mxu1 %v723_v46 }
  0x57   :  { %588 = vmatprep.subr.bf16.mxu0 %v714_v48  ;;  %628 = vmatprep.subr.bf16.mxu1 %v716_v49 }
  0x5e   :  { %589 = vmatpush1.bf16.xpose.msra.mxu0 %v713_v54  ;;  %629 = vmatpush1.bf16.xpose.msra.mxu1 %v715_v55 }
  0x5f   :  { %590 = vmatprep.subr.bf16.mxu0 %v706_v56  ;;  %630 = vmatprep.subr.bf16.mxu1 %v708_v57 }
  0x66   :  { %591 = vmatpush1.bf16.xpose.msra.mxu0 %v705_v62  ;;  %631 = vmatpush1.bf16.xpose.msra.mxu1 %v707_v63 }
  0x67   :  { %592 = vmatprep.subr.bf16.mxu0 %v698_v0  ;;  %632 = vmatprep.subr.bf16.mxu1 %v700_v1 }
  0x6e   :  { %593 = vmatpush1.bf16.xpose.msra.mxu0 %v697_v6  ;;  %633 = vmatpush1.bf16.xpose.msra.mxu1 %v699_v7 }
  0x6f   :  { %594 = vmatprep.subr.bf16.mxu0 %v690_v8  ;;  %634 = vmatprep.subr.bf16.mxu1 %v692_v9 }
  0x76   :  { %595 = vmatpush1.bf16.xpose.msra.mxu0 %v689_v14  ;;  %635 = vmatpush1.bf16.xpose.msra.mxu1 %v691_v15 }
  0x77   :  { %596 = vmatprep.subr.bf16.mxu0 %v682_v16  ;;  %636 = vmatprep.subr.bf16.mxu1 %v684_v17 }
  0x7e   :  { %597 = vmatpush1.bf16.xpose.msra.mxu0 %v681_v18  ;;  %637 = vmatpush1.bf16.xpose.msra.mxu1 %v683_v19 }
  0x85   :  { %615 = vmatmul.mubr.bf16.vlgmr.msra.gmra.mxu0 %v837_v47  ;;  %655 = vmatmul.mubr.bf16.vlgmr.msra.gmra.mxu1 %v171_v20  ;;  %v58_v47 = vld [vmem:[%s990_s2] sm:$0x3] }
 0x105   :  { %v536_v22 = vpop.f32.mrf.mxu0  ;;  %v576_v24 = vpop.f32.mrf.mxu1 }
 0x106   :  { %v577_v31 = vadd.f32 %v576_v24, %v536_v22 }
 0x107   :  { %v538_v25 = vpop.f32.mrf.mxu0  ;;  %v578_v26 = vpop.f32.mrf.mxu1 }
 0x109   :  { %v539_v27 = vpop.f32.mrf.mxu0  ;;  %v579_v28 = vpop.f32.mrf.mxu1 }
 0x10b   :  { %v540_v29 = vpop.f32.mrf.mxu0  ;;  %v580_v30 = vpop.f32.mrf.mxu1 }
 0x145   :  { %v616_v32 = vpop.f32.mrf.mxu0  ;;  %v656_v34 = vpop.f32.mrf.mxu1 }
 0x146   :  { %v617_v33 = vadd.f32 %v616_v32, %v577_v31 }
 0x147   :  { %v618_v23 = vpop.f32.mrf.mxu0  ;;  %v658_v36 = vpop.f32.mrf.mxu1 }
 0x148   :  { %v657_v35 = vadd.f32 %v656_v34, %v617_v33 }
 0x149   :  { %v619_v37 = vpop.f32.mrf.mxu0  ;;  %v659_v39 = vpop.f32.mrf.mxu1 }
 0x14a   :  { %v662_v38 = vadd.f32 %v657_v35, %v58_v47 }
 0x14b   :  { %v620_v40 = vpop.f32.mrf.mxu0  ;;  %v660_v41 = vpop.f32.mrf.mxu1 }
 0x14c   :  { %663 = vst [vmem:[%s990_s2] sm:$0x3] %v662_v38 }

// kernel: encoder_features.5
= control target key start
LH: loop header
LB: loop body
LE: loop exit
PB: predicated region body
PF: predicated region fallthrough
CT: control target
= control target key end

     0   :  { %v459_v10 = vmov 1966171168   ;;  %v104_v12 = vlaneseq  ;;  %v460_v44 = vmov 0.0   ;;  %s584_s1 = inlined_call_operand.vmem [shape: bf16[128,512], index: 1, kind: input, shape index: {}]   ;;  %s585_s0 = inlined_call_operand.vmem [shape: bf16[2,512], index: 0, kind: input, shape index: {}]   ;;  %s586_s2 = inlined_call_operand.vmem [shape: f32[1,2,128], index: 2, kind: output, shape index: {}]  }
   0x1   :  { %v411_v0 = vld [vmem:[%s584_s1 + $0xe4] ss:$16 sps:$4 sm:$0xff]   ;;  %v413_v1 = vld [vmem:[%s584_s1 + $0xec] ss:$16 sps:$4 sm:$0xff]   ;;  %v415_v2 = vld [vmem:[%s584_s1 + $0xe0] ss:$16 sps:$4 sm:$0xff]   ;;  %v102_v11 = vunpack.c.l.s4 %v459_v10 }
   0x2   :  { %281 = vmatprep.subr.bf16.mxu0 %v411_v0  ;;  %v416_v3 = vld [vmem:[%s584_s1 + $0xe8] ss:$16 sps:$4 sm:$0xff]   ;;  %321 = vmatprep.subr.bf16.mxu1 %v413_v1  ;;  %v417_v4 = vld [vmem:[%s584_s1 + $0xc4] ss:$16 sps:$4 sm:$0xff]   ;;  %v419_v5 = vld [vmem:[%s584_s1 + $0xcc] ss:$16 sps:$4 sm:$0xff]  }
   0x3   :  { %282 = vmatpush1.bf16.xpose.msra.mxu0 %v415_v2  ;;  %322 = vmatpush1.bf16.xpose.msra.mxu1 %v416_v3  ;;  %v421_v6 = vld [vmem:[%s584_s1 + $0xc0] ss:$16 sps:$4 sm:$0xff]   ;;  %v422_v7 = vld [vmem:[%s584_s1 + $0xc8] ss:$16 sps:$4 sm:$0xff]   ;;  %v423_v8 = vld [vmem:[%s584_s1 + $0xa4] ss:$16 sps:$4 sm:$0xff]   ;;  %v103_v16 = vunpack.c.0.s8 %v102_v11 }
   0x4   :  { %283 = vmatprep.subr.bf16.mxu0 %v417_v4  ;;  %323 = vmatprep.subr.bf16.mxu1 %v419_v5  ;;  %v425_v9 = vld [vmem:[%s584_s1 + $0xac] ss:$16 sps:$4 sm:$0xff]   ;;  %v427_v13 = vld [vmem:[%s584_s1 + $0xa0] ss:$16 sps:$4 sm:$0xff]   ;;  %v428_v14 = vld [vmem:[%s584_s1 + $0xa8] ss:$16 sps:$4 sm:$0xff]  }
   0x5   :  { %v429_v15 = vld [vmem:[%s584_s1 + $0x84] ss:$16 sps:$4 sm:$0xff]   ;;  %v105_v17 = vshrl.u32 %v104_v12, 7  ;;  %v431_v18 = vld [vmem:[%s584_s1 + $0x8c] ss:$16 sps:$4 sm:$0xff]   ;;  %57 = vst [vmem:[%s586_s2] sm:$0x3] %v460_v44 }
   0x6   :  { %v376_v20 = vld.sshfl [vmem:[%s585_s0] sm:$0x33 pattern:$0x75316420]  ;;  %v434_v23 = vld [vmem:[%s584_s1 + $0x88] ss:$16 sps:$4 sm:$0xff]  }
   0x7   :  { %v106_v19 = vsub.s32 %v103_v16, %v105_v17  ;;  %v100_v21 = vcombine.high %v376_v20, %v376_v20  ;;  %v433_v22 = vld [vmem:[%s584_s1 + $0x80] ss:$16 sps:$4 sm:$0xff]   ;;  %v435_v25 = vld [vmem:[%s584_s1 + $0x64] ss:$16 sps:$4 sm:$0xff]   ;;  %v437_v26 = vld [vmem:[%s584_s1 + $0x6c] ss:$16 sps:$4 sm:$0xff]  }
   0x8   :  { %v439_v28 = vld [vmem:[%s584_s1 + $0x60] ss:$16 sps:$4 sm:$0xff]   ;;  %v440_v29 = vld [vmem:[%s584_s1 + $0x68] ss:$16 sps:$4 sm:$0xff]   ;;  %v441_v30 = vld [vmem:[%s584_s1 + $0x44] ss:$16 sps:$4 sm:$0xff]  }
   0x9   :  { %v114_v24 = vrot.slane %v100_v21, %v106_v19  ;;  %v443_v31 = vld [vmem:[%s584_s1 + $0x4c] ss:$16 sps:$4 sm:$0xff]   ;;  %v445_v32 = vld [vmem:[%s584_s1 + $0x40] ss:$16 sps:$4 sm:$0xff]   ;;  %v446_v33 = vld [vmem:[%s584_s1 + $0x48] ss:$16 sps:$4 sm:$0xff]   ;;  %v107_v42 = vrot.slane %v376_v20, %v106_v19 }
   0xa   :  { %v447_v34 = vld [vmem:[%s584_s1 + $0x24] ss:$16 sps:$4 sm:$0xff]   ;;  %v449_v35 = vld [vmem:[%s584_s1 + $0x2c] ss:$16 sps:$4 sm:$0xff]   ;;  %v451_v36 = vld [vmem:[%s584_s1 + $0x20] ss:$16 sps:$4 sm:$0xff]  }
   0xb   :  { %284 = vmatpush1.bf16.xpose.msra.mxu0 %v421_v6  ;;  %324 = vmatpush1.bf16.xpose.msra.mxu1 %v422_v7  ;;  %v116_v27 = vcombine.high %v114_v24, %v114_v24  ;;  %v452_v37 = vld [vmem:[%s584_s1 + $0x28] ss:$16 sps:$4 sm:$0xff]   ;;  %v453_v38 = vld [vmem:[%s584_s1 + $0x4] ss:$16 sps:$4 sm:$0xff]   ;;  %v455_v39 = vld [vmem:[%s584_s1 + $0xc] ss:$16 sps:$4 sm:$0xff]   ;;  %v115_v43 = vcombine.high %v107_v42, %v107_v42 }
   0xc   :  { %285 = vmatprep.subr.bf16.mxu0 %v423_v8  ;;  %325 = vmatprep.subr.bf16.mxu1 %v425_v9  ;;  %v457_v40 = vld [vmem:[%s584_s1] ss:$16 sps:$4 sm:$0xff]   ;;  %v458_v41 = vld [vmem:[%s584_s1 + $0x8] ss:$16 sps:$4 sm:$0xff]  }
   0xd   :  { %313 = vmatprep.mubr.bf16.mxu0 %v114_v24  ;;  %353 = vmatprep.mubr.bf16.mxu1 %v116_v27  ;;  %v58_v46 = vld [vmem:[%s586_s2] sm:$0x3] }
  0x13   :  { %286 = vmatpush1.bf16.xpose.msra.mxu0 %v427_v13  ;;  %326 = vmatpush1.bf16.xpose.msra.mxu1 %v428_v14 }
  0x14   :  { %287 = vmatprep.subr.bf16.mxu0 %v429_v15  ;;  %327 = vmatprep.subr.bf16.mxu1 %v431_v18 }
  0x1b   :  { %288 = vmatpush1.bf16.xpose.msra.mxu0 %v433_v22  ;;  %328 = vmatpush1.bf16.xpose.msra.mxu1 %v434_v23 }
  0x1c   :  { %289 = vmatprep.subr.bf16.mxu0 %v435_v25  ;;  %329 = vmatprep.subr.bf16.mxu1 %v437_v26 }
  0x23   :  { %290 = vmatpush1.bf16.xpose.msra.mxu0 %v439_v28  ;;  %330 = vmatpush1.bf16.xpose.msra.mxu1 %v440_v29 }
  0x24   :  { %291 = vmatprep.subr.bf16.mxu0 %v441_v30  ;;  %331 = vmatprep.subr.bf16.mxu1 %v443_v31 }
  0x2b   :  { %292 = vmatpush1.bf16.xpose.msra.mxu0 %v445_v32  ;;  %332 = vmatpush1.bf16.xpose.msra.mxu1 %v446_v33 }
  0x2c   :  { %293 = vmatprep.subr.bf16.mxu0 %v447_v34  ;;  %333 = vmatprep.subr.bf16.mxu1 %v449_v35 }
  0x33   :  { %294 = vmatpush1.bf16.xpose.msra.mxu0 %v451_v36  ;;  %334 = vmatpush1.bf16.xpose.msra.mxu1 %v452_v37 }
  0x34   :  { %295 = vmatprep.subr.bf16.mxu0 %v453_v38  ;;  %335 = vmatprep.subr.bf16.mxu1 %v455_v39 }
  0x3b   :  { %296 = vmatpush1.bf16.xpose.msra.mxu0 %v457_v40  ;;  %336 = vmatpush1.bf16.xpose.msra.mxu1 %v458_v41 }
  0x42   :  { %314 = vmatmul.mubr.bf16.vlgmr.msra.gmra.mxu0 %v107_v42  ;;  %354 = vmatmul.mubr.bf16.vlgmr.msra.gmra.mxu1 %v115_v43 }
 0x102   :  { %v315_v45 = vpop.f32.mrf.mxu0  ;;  %v355_v47 = vpop.f32.mrf.mxu1 }
 0x103   :  { %v356_v48 = vadd.f32 %v355_v47, %v315_v45 }
 0x104   :  { %v317_v49 = vpop.f32.mrf.mxu0  ;;  %v357_v50 = vpop.f32.mrf.mxu1 }
 0x105   :  { %v361_v51 = vadd.f32 %v356_v48, %v58_v46 }
 0x106   :  { %v318_v52 = vpop.f32.mrf.mxu0  ;;  %v358_v53 = vpop.f32.mrf.mxu1 }
 0x107   :  { %362 = vst [vmem:[%s586_s2] sm:$0x3] %v361_v51 }
 0x108   :  { %v319_v54 = vpop.f32.mrf.mxu0  ;;  %v359_v55 = vpop.f32.mrf.mxu1 }

</bundles_post_ra>
